<compile_context>
chip_gen: v6e
topology: v6e:2x2x1
jax: 0.10.0
libtpu: 0.0.40
codegen_flags: <defaults>
</compile_context>

<pallas_src>
import math

import jax
import jax.numpy as jnp
from jax.experimental import pallas as pl
from jax.experimental.pallas import tpu as pltpu


def _rnn2_kernel(idx_ref,        # SMEM (B,)  int32 token ids
                 hid_ref,        # VMEM (2, B, H) f32 previous hidden
                 w_ih0t_hbm,     # HBM  (V, H) f32  == W_ih0^T  (embedding table, stays in HBM)
                 w_hh0t_ref,     # VMEM (H, H) f32  == W_hh0^T
                 b0_ref,         # VMEM (1, H) f32  == b_ih0 + b_hh0
                 w1_ref,         # VMEM (2H, H) f32 == [W_ih1^T ; W_hh1^T]
                 b1_ref,         # VMEM (1, H) f32  == b_ih1 + b_hh1
                 out_ref,        # VMEM (2, B, H) f32 new hidden
                 x_emb,          # VMEM scratch (B, H) f32 gathered embedding rows
                 dma_sems):      # DMA semaphores (B,)
    B = hid_ref.shape[1]
    H = hid_ref.shape[2]
    V = w_ih0t_hbm.shape[0]

    # onehot(idx) @ W_ih0^T is a row-select of W_ih0^T.  Gather only the B needed rows from
    # HBM into VMEM scratch.  Clamp the dynamic row index (DMA bounds check would fault on a
    # genuinely OOB address); invalid ids are zeroed after the wait to match one_hot semantics.
    ids = []
    copies = []
    for b in range(B):                                   # B is static & tiny; unrolled at trace
        i = idx_ref[b]
        i_safe = jnp.minimum(jnp.maximum(i, 0), V - 1)
        cp = pltpu.make_async_copy(
            w_ih0t_hbm.at[pl.ds(i_safe, 1), :],          # (1, H) row in HBM
            x_emb.at[pl.ds(b, 1), :],                    # (1, H) row in VMEM scratch
            dma_sems.at[b])
        cp.start()
        ids.append(i)
        copies.append(cp)

    # Overlap: recurrent matmul of layer 0 runs while the row DMAs are in flight.
    h0 = hid_ref[0]                                      # (B, H)
    h1 = hid_ref[1]                                      # (B, H)
    hh0 = jnp.dot(h0, w_hh0t_ref[...], preferred_element_type=jnp.float32)

    # Wait for the gathered rows; zero rows for out-of-range ids (one_hot semantics).
    for b in range(B):
        copies[b].wait()
        invalid = jnp.logical_or(ids[b] < 0, ids[b] >= V)

        @pl.when(invalid)
        def _(b=b):
            x_emb[pl.ds(b, 1), :] = jnp.zeros((1, H), jnp.float32)

    # Layer 0.
    h0_new = jnp.tanh(x_emb[...] + hh0 + b0_ref[...])

    # Layer 1: single fused MXU matmul against the stacked weight [W_ih1^T ; W_hh1^T].
    h1_in = jnp.concatenate([h0_new, h1], axis=-1)       # (B, 2H)
    h1_new = jnp.tanh(
        jnp.dot(h1_in, w1_ref[...], preferred_element_type=jnp.float32) + b1_ref[...])

    # Direct (L, B, H) stores — no lane concat, no wrapper transpose.
    out_ref[0] = h0_new
    out_ref[1] = h1_new


def prepare_params(params):
    """One-time parameter prep: pre-transpose weights, stack layer-1 weights, fold bias pairs."""
    def bias(x):
        return jnp.asarray(x, jnp.float32).reshape(1, -1)     # torch biases are (H,)

    w_ih1t = jnp.asarray(params["w_ih1"], jnp.float32).T      # (H, H)
    w_hh1t = jnp.asarray(params["w_hh1"], jnp.float32).T      # (H, H)
    return {
        "w_ih0t": jnp.asarray(params["w_ih0"], jnp.float32).T,   # (V, H)  stays in HBM
        "w_hh0t": jnp.asarray(params["w_hh0"], jnp.float32).T,   # (H, H)
        "b0": bias(params["b_ih0"]) + bias(params["b_hh0"]),     # (1, H)
        "w1": jnp.concatenate([w_ih1t, w_hh1t], axis=0),         # (2H, H)
        "b1": bias(params["b_ih1"]) + bias(params["b_hh1"]),     # (1, H)
    }


def similarity_model_forward(idx, hidden, prepped):
    """idx: (B,) int; hidden: (L=2, B, H) f32; prepped: output of prepare_params()."""
    B = idx.shape[0]
    L, B2, H = hidden.shape
    assert L == 2 and B2 == B, "kernel is specialized to num_layers == 2"
    V = prepped["w_ih0t"].shape[0]

    flops = 2 * B * H * H + 2 * B * (2 * H) * H              # layer-0 hh + fused layer-1
    bytes_accessed = 4 * (B                                    # ids
                          + 2 * B * H                          # hidden in
                          + B * H                              # gathered embedding rows
                          + H * H + 2 * H * H + 2 * H          # weights + biases
                          + 2 * B * H)                         # hidden out
    cost = pl.CostEstimate(flops=flops, transcendentals=2 * B * H,
                           bytes_accessed=bytes_accessed)

    smem_spec = pl.BlockSpec(memory_space=pltpu.MemorySpace.SMEM)
    vmem_spec = pl.BlockSpec(memory_space=pltpu.MemorySpace.VMEM)
    hbm_spec = pl.BlockSpec(memory_space=pl.ANY)

    return pl.pallas_call(
        _rnn2_kernel,
        out_shape=jax.ShapeDtypeStruct((L, B, H), jnp.float32),
        in_specs=[smem_spec,   # idx
                  vmem_spec,   # hidden
                  hbm_spec,    # W_ih0^T table (HBM, row-gathered in kernel)
                  vmem_spec,   # W_hh0^T
                  vmem_spec,   # b0
                  vmem_spec,   # W1 stacked
                  vmem_spec],  # b1
        out_specs=vmem_spec,
        scratch_shapes=[pltpu.VMEM((B, H), jnp.float32),
                        pltpu.SemaphoreType.DMA((B,))],
        input_output_aliases={1: 0},                        # alias hidden carry -> new hidden
        cost_estimate=cost,
    )(idx.astype(jnp.int32), hidden,
      prepped["w_ih0t"], prepped["w_hh0t"], prepped["b0"],
      prepped["w1"], prepped["b1"])


def _reference_forward(idx, hidden, params):
    """Pure-JAX reference matching torch.nn.RNN(tanh) semantics for seq_len=1."""
    V = params["w_ih0"].shape[1]
    onehot = jax.nn.one_hot(idx, V, dtype=jnp.float32)
    h0, h1 = hidden[0], hidden[1]
    h0n = jnp.tanh(onehot @ params["w_ih0"].T + params["b_ih0"]
                   + h0 @ params["w_hh0"].T + params["b_hh0"])
    h1n = jnp.tanh(h0n @ params["w_ih1"].T + params["b_ih1"]
                   + h1 @ params["w_hh1"].T + params["b_hh1"])
    return jnp.stack([h0n, h1n], axis=0)


if __name__ == "__main__":
    # Module constants: hidden_size = 2**NUM_QUBITS = 16, num_layers = 2. vocab_size is a
    # constructor argument; pick a small synthetic value.
    B = 2          # batch
    V = 64         # vocab_size
    H = 16         # hidden_size
    L = 2          # num_layers

    key = jax.random.PRNGKey(0)
    ks = jax.random.split(key, 10)
    bound = 1.0 / math.sqrt(H)   # PyTorch nn.RNN init range

    def init(k, shape):
        return jax.random.uniform(k, shape, jnp.float32, -bound, bound)

    params = {
        "w_ih0": init(ks[0], (H, V)),
        "w_hh0": init(ks[1], (H, H)),
        "b_ih0": init(ks[2], (H,)),
        "b_hh0": init(ks[3], (H,)),
        "w_ih1": init(ks[4], (H, H)),
        "w_hh1": init(ks[5], (H, H)),
        "b_ih1": init(ks[6], (H,)),
        "b_hh1": init(ks[7], (H,)),
    }

    idx = jax.random.randint(ks[8], (B,), 0, V, dtype=jnp.int32)
    hidden = jax.random.normal(ks[9], (L, B, H), dtype=jnp.float32)

    prepped = prepare_params(params)
    out = jax.block_until_ready(similarity_model_forward(idx, hidden, prepped))

    ref = _reference_forward(idx, hidden, params)
    assert out.shape == (L, B, H)
    assert jnp.allclose(out, ref, atol=1e-5, rtol=1e-5), "kernel mismatch vs reference"

    print("KERNEL_OK")
</pallas_src>

<mosaic_0001>
module attributes {stable_mosaic.version = 11 : i64} {
  func.func @_rnn2_kernel(%arg0: memref<2xi32, #tpu.memory_space<smem>>, %arg1: memref<2x2x16xf32, #tpu.memory_space<vmem>>, %arg2: memref<64x16xf32, #tpu.memory_space<any>>, %arg3: memref<16x16xf32, #tpu.memory_space<vmem>>, %arg4: memref<1x16xf32, #tpu.memory_space<vmem>>, %arg5: memref<32x16xf32, #tpu.memory_space<vmem>>, %arg6: memref<1x16xf32, #tpu.memory_space<vmem>>, %arg7: memref<2x2x16xf32, #tpu.memory_space<vmem>>, %arg8: memref<2x16xf32, #tpu.memory_space<vmem>>, %arg9: memref<2x!tpu.dma_semaphore, #tpu.memory_space<semaphore_mem>>) attributes {dimension_semantics = [], scalar_prefetch = 0 : i64, scratch_operands = 2 : i64, tpu.core_type = #tpu.core_type<tc>} {
    %c0 = arith.constant 0 : index
    %0 = memref.load %arg0[%c0] : memref<2xi32, #tpu.memory_space<smem>>
    %c0_i32 = arith.constant 0 : i32
    %1 = arith.maxsi %0, %c0_i32 : i32
    %c63_i32 = arith.constant 63 : i32
    %2 = arith.minsi %1, %c63_i32 : i32
    %c0_i32_0 = arith.constant 0 : i32
    %c0_i32_1 = arith.constant 0 : i32
    %3 = tpu.memref_slice %arg2[%2, %c0_i32_1] : memref<64x16xf32, #tpu.memory_space<any>> -> memref<1x16xf32, #tpu.memory_space<any>>
    %c0_i32_2 = arith.constant 0 : i32
    %c0_i32_3 = arith.constant 0 : i32
    %4 = tpu.memref_slice %arg8[%c0_i32_2, %c0_i32_3] : memref<2x16xf32, #tpu.memory_space<vmem>> -> memref<1x16xf32, #tpu.memory_space<vmem>>
    %5 = tpu.memref_slice %arg9[%c0_i32_0] : memref<2x!tpu.dma_semaphore, #tpu.memory_space<semaphore_mem>> -> memref<1x!tpu.dma_semaphore, #tpu.memory_space<semaphore_mem>>
    %6 = tpu.memref_squeeze %5 : memref<1x!tpu.dma_semaphore, #tpu.memory_space<semaphore_mem>> -> memref<!tpu.dma_semaphore, #tpu.memory_space<semaphore_mem>>
    tpu.enqueue_dma source(%3 : memref<1x16xf32, #tpu.memory_space<any>>) target(%4 : memref<1x16xf32, #tpu.memory_space<vmem>>) target_semaphore(%6 : memref<!tpu.dma_semaphore, #tpu.memory_space<semaphore_mem>>)
    %c1 = arith.constant 1 : index
    %7 = memref.load %arg0[%c1] : memref<2xi32, #tpu.memory_space<smem>>
    %c0_i32_4 = arith.constant 0 : i32
    %8 = arith.maxsi %7, %c0_i32_4 : i32
    %c63_i32_5 = arith.constant 63 : i32
    %9 = arith.minsi %8, %c63_i32_5 : i32
    %c1_i32 = arith.constant 1 : i32
    %c0_i32_6 = arith.constant 0 : i32
    %10 = tpu.memref_slice %arg2[%9, %c0_i32_6] : memref<64x16xf32, #tpu.memory_space<any>> -> memref<1x16xf32, #tpu.memory_space<any>>
    %c1_i32_7 = arith.constant 1 : i32
    %c0_i32_8 = arith.constant 0 : i32
    %11 = tpu.memref_slice %arg8[%c1_i32_7, %c0_i32_8] : memref<2x16xf32, #tpu.memory_space<vmem>> -> memref<1x16xf32, #tpu.memory_space<vmem>>
    %12 = tpu.memref_slice %arg9[%c1_i32] : memref<2x!tpu.dma_semaphore, #tpu.memory_space<semaphore_mem>> -> memref<1x!tpu.dma_semaphore, #tpu.memory_space<semaphore_mem>>
    %13 = tpu.memref_squeeze %12 : memref<1x!tpu.dma_semaphore, #tpu.memory_space<semaphore_mem>> -> memref<!tpu.dma_semaphore, #tpu.memory_space<semaphore_mem>>
    tpu.enqueue_dma source(%10 : memref<1x16xf32, #tpu.memory_space<any>>) target(%11 : memref<1x16xf32, #tpu.memory_space<vmem>>) target_semaphore(%13 : memref<!tpu.dma_semaphore, #tpu.memory_space<semaphore_mem>>)
    %c0_9 = arith.constant 0 : index
    %c0_10 = arith.constant 0 : index
    %c0_11 = arith.constant 0 : index
    %14 = vector.load %arg1[%c0_9, %c0_10, %c0_11] : memref<2x2x16xf32, #tpu.memory_space<vmem>>, vector<1x2x16xf32>
    %15 = vector.shape_cast %14 : vector<1x2x16xf32> to vector<2x16xf32>
    %c1_12 = arith.constant 1 : index
    %c0_13 = arith.constant 0 : index
    %c0_14 = arith.constant 0 : index
    %16 = vector.load %arg1[%c1_12, %c0_13, %c0_14] : memref<2x2x16xf32, #tpu.memory_space<vmem>>, vector<1x2x16xf32>
    %17 = vector.shape_cast %16 : vector<1x2x16xf32> to vector<2x16xf32>
    %c0_15 = arith.constant 0 : index
    %c0_16 = arith.constant 0 : index
    %18 = vector.load %arg3[%c0_15, %c0_16] : memref<16x16xf32, #tpu.memory_space<vmem>>, vector<16x16xf32>
    %cst = arith.constant dense<0.000000e+00> : vector<2x16xf32>
    %19 = tpu.matmul %15, %18, %cst {dimension_numbers = #tpu.dot_dimension_numbers<[1], [0], [0], [1], [0, 0, 1, 1], [], []>} : vector<2x16xf32>, vector<16x16xf32>, vector<2x16xf32> -> vector<2x16xf32>
    %c0_i32_17 = arith.constant 0 : i32
    %c0_i32_18 = arith.constant 0 : i32
    %20 = tpu.memref_slice %arg2[%2, %c0_i32_18] : memref<64x16xf32, #tpu.memory_space<any>> -> memref<1x16xf32, #tpu.memory_space<any>>
    %c0_i32_19 = arith.constant 0 : i32
    %c0_i32_20 = arith.constant 0 : i32
    %21 = tpu.memref_slice %arg8[%c0_i32_19, %c0_i32_20] : memref<2x16xf32, #tpu.memory_space<vmem>> -> memref<1x16xf32, #tpu.memory_space<vmem>>
    %22 = tpu.memref_slice %arg9[%c0_i32_17] : memref<2x!tpu.dma_semaphore, #tpu.memory_space<semaphore_mem>> -> memref<1x!tpu.dma_semaphore, #tpu.memory_space<semaphore_mem>>
    %23 = tpu.memref_squeeze %22 : memref<1x!tpu.dma_semaphore, #tpu.memory_space<semaphore_mem>> -> memref<!tpu.dma_semaphore, #tpu.memory_space<semaphore_mem>>
    tpu.wait_dma2 semaphore(%23 : memref<!tpu.dma_semaphore, #tpu.memory_space<semaphore_mem>>) src(%20 : memref<1x16xf32, #tpu.memory_space<any>>) dst(%21 : memref<1x16xf32, #tpu.memory_space<vmem>>)
    %c0_i32_21 = arith.constant 0 : i32
    %24 = arith.cmpi slt, %0, %c0_i32_21 : i32
    %c64_i32 = arith.constant 64 : i32
    %25 = arith.cmpi sge, %0, %c64_i32 : i32
    %26 = arith.ori %24, %25 : i1
    %27 = arith.extui %26 : i1 to i32
    %c0_i32_22 = arith.constant 0 : i32
    %28 = arith.cmpi ne, %27, %c0_i32_22 : i32
    scf.if %28 {
      %cst_45 = arith.constant 0.000000e+00 : f32
      %57 = vector.broadcast %cst_45 : f32 to vector<1x16xf32>
      %c0_46 = arith.constant 0 : index
      %c0_47 = arith.constant 0 : index
      %58 = vector.load %arg8[%c0_46, %c0_47] : memref<2x16xf32, #tpu.memory_space<vmem>>, vector<1x16xf32>
      tpu.vector_store %arg8[%c0_46, %c0_47], %57 {strides = array<i32>} : memref<2x16xf32, #tpu.memory_space<vmem>>, vector<1x16xf32>,
    } else {
    }
    %c1_i32_23 = arith.constant 1 : i32
    %c0_i32_24 = arith.constant 0 : i32
    %29 = tpu.memref_slice %arg2[%9, %c0_i32_24] : memref<64x16xf32, #tpu.memory_space<any>> -> memref<1x16xf32, #tpu.memory_space<any>>
    %c1_i32_25 = arith.constant 1 : i32
    %c0_i32_26 = arith.constant 0 : i32
    %30 = tpu.memref_slice %arg8[%c1_i32_25, %c0_i32_26] : memref<2x16xf32, #tpu.memory_space<vmem>> -> memref<1x16xf32, #tpu.memory_space<vmem>>
    %31 = tpu.memref_slice %arg9[%c1_i32_23] : memref<2x!tpu.dma_semaphore, #tpu.memory_space<semaphore_mem>> -> memref<1x!tpu.dma_semaphore, #tpu.memory_space<semaphore_mem>>
    %32 = tpu.memref_squeeze %31 : memref<1x!tpu.dma_semaphore, #tpu.memory_space<semaphore_mem>> -> memref<!tpu.dma_semaphore, #tpu.memory_space<semaphore_mem>>
    tpu.wait_dma2 semaphore(%32 : memref<!tpu.dma_semaphore, #tpu.memory_space<semaphore_mem>>) src(%29 : memref<1x16xf32, #tpu.memory_space<any>>) dst(%30 : memref<1x16xf32, #tpu.memory_space<vmem>>)
    %c0_i32_27 = arith.constant 0 : i32
    %33 = arith.cmpi slt, %7, %c0_i32_27 : i32
    %c64_i32_28 = arith.constant 64 : i32
    %34 = arith.cmpi sge, %7, %c64_i32_28 : i32
    %35 = arith.ori %33, %34 : i1
    %36 = arith.extui %35 : i1 to i32
    %c0_i32_29 = arith.constant 0 : i32
    %37 = arith.cmpi ne, %36, %c0_i32_29 : i32
    scf.if %37 {
      %cst_45 = arith.constant 0.000000e+00 : f32
      %57 = vector.broadcast %cst_45 : f32 to vector<1x16xf32>
      %c1_46 = arith.constant 1 : index
      %c0_47 = arith.constant 0 : index
      %58 = vector.load %arg8[%c1_46, %c0_47] : memref<2x16xf32, #tpu.memory_space<vmem>>, vector<1x16xf32>
      tpu.vector_store %arg8[%c1_46, %c0_47], %57 {strides = array<i32>} : memref<2x16xf32, #tpu.memory_space<vmem>>, vector<1x16xf32>,
    } else {
    }
    %c0_30 = arith.constant 0 : index
    %c0_31 = arith.constant 0 : index
    %38 = vector.load %arg8[%c0_30, %c0_31] : memref<2x16xf32, #tpu.memory_space<vmem>>, vector<2x16xf32>
    %39 = arith.addf %38, %19 : vector<2x16xf32>
    %c0_32 = arith.constant 0 : index
    %c0_33 = arith.constant 0 : index
    %40 = vector.load %arg4[%c0_32, %c0_33] : memref<1x16xf32, #tpu.memory_space<vmem>>, vector<1x16xf32>
    %41 = vector.broadcast %40 : vector<1x16xf32> to vector<2x16xf32>
    %42 = arith.addf %39, %41 : vector<2x16xf32>
    %43 = math.tanh %42 : vector<2x16xf32>
    %44 = tpu.concatenate %43, %17 in 1 : vector<2x16xf32>, vector<2x16xf32> -> vector<2x32xf32>
    %c0_34 = arith.constant 0 : index
    %c0_35 = arith.constant 0 : index
    %45 = vector.load %arg5[%c0_34, %c0_35] : memref<32x16xf32, #tpu.memory_space<vmem>>, vector<32x16xf32>
    %cst_36 = arith.constant dense<0.000000e+00> : vector<2x16xf32>
    %46 = tpu.matmul %44, %45, %cst_36 {dimension_numbers = #tpu.dot_dimension_numbers<[1], [0], [0], [1], [0, 0, 1, 1], [], []>} : vector<2x32xf32>, vector<32x16xf32>, vector<2x16xf32> -> vector<2x16xf32>
    %c0_37 = arith.constant 0 : index
    %c0_38 = arith.constant 0 : index
    %47 = vector.load %arg6[%c0_37, %c0_38] : memref<1x16xf32, #tpu.memory_space<vmem>>, vector<1x16xf32>
    %48 = vector.broadcast %47 : vector<1x16xf32> to vector<2x16xf32>
    %49 = arith.addf %46, %48 : vector<2x16xf32>
    %50 = math.tanh %49 : vector<2x16xf32>
    %c0_39 = arith.constant 0 : index
    %c0_40 = arith.constant 0 : index
    %c0_41 = arith.constant 0 : index
    %51 = vector.load %arg7[%c0_39, %c0_40, %c0_41] : memref<2x2x16xf32, #tpu.memory_space<vmem>>, vector<1x2x16xf32>
    %52 = vector.shape_cast %51 : vector<1x2x16xf32> to vector<2x16xf32>
    %53 = vector.shape_cast %43 : vector<2x16xf32> to vector<1x2x16xf32>
    tpu.vector_store %arg7[%c0_39, %c0_40, %c0_41], %53 {strides = array<i32>} : memref<2x2x16xf32, #tpu.memory_space<vmem>>, vector<1x2x16xf32>,
    %c1_42 = arith.constant 1 : index
    %c0_43 = arith.constant 0 : index
    %c0_44 = arith.constant 0 : index
    %54 = vector.load %arg7[%c1_42, %c0_43, %c0_44] : memref<2x2x16xf32, #tpu.memory_space<vmem>>, vector<1x2x16xf32>
    %55 = vector.shape_cast %54 : vector<1x2x16xf32> to vector<2x16xf32>
    %56 = vector.shape_cast %50 : vector<2x16xf32> to vector<1x2x16xf32>
    tpu.vector_store %arg7[%c1_42, %c0_43, %c0_44], %56 {strides = array<i32>} : memref<2x2x16xf32, #tpu.memory_space<vmem>>, vector<1x2x16xf32>,
    return
  }
}

</mosaic_0001>

<bundles_post_ra>
// kernel: tpu_custom_call.1
= control target key start
LH: loop header
LB: loop body
LE: loop exit
PB: predicated region body
PF: predicated region fallthrough
CT: control target
= control target key end

     0   :  { %12 = vsyncpa [#allocation7], 0  ;;  %s654_s0 = inlined_call_operand.vmem [shape: s32[2], index: 0, kind: input, shape index: {}]   ;;  %s655_s1 = inlined_call_operand.hbm [shape: f32[2,2,16], index: 1, kind: input, shape index: {}, may-alias: {1,7}]   ;;  %s656_s2 = inlined_call_operand.vmem [shape: f32[64,16], index: 2, kind: input, shape index: {}]   ;;  %s657_s3 = inlined_call_operand.vmem [shape: f32[16,16], index: 3, kind: input, shape index: {}]   ;;  %s658_s4 = inlined_call_operand.vmem [shape: f32[1,16], index: 4, kind: input, shape index: {}]   ;;  %s659_s5 = inlined_call_operand.vmem [shape: f32[32,16], index: 5, kind: input, shape index: {}]   ;;  %s660_s6 = inlined_call_operand.vmem [shape: f32[1,16], index: 6, kind: input, shape index: {}]   ;;  %s661_s7 = inlined_call_operand.hbm [shape: f32[2,2,16], index: 7, kind: output, shape index: {}, may-alias: {1,7}]  }
   0x1   :  { %13 = vsyncpa [#allocation5], 0 }
   0x2   :  { %14 = vsyncpa [#allocation6], 0  ;;  %s21_s26 = sshll.u32 %s654_s0, 4  ;;  %s22_s26 = int_to_ptr.vmem [resolvable:$true] %s21_s26 }
   0x3   :  { %s479_s27 = scalar_lea.vmem %s22_s26, 16  ;;  %p484_p1 = scmp.lt.s32.totalorder %s22_s26, %s22_s26 }
   0x4   :  { %p480_p0 = scmp.ne.s32.totalorder %s22_s26, %s479_s27  ;;  %p485_p2 = scmp.lt.s32.totalorder %s479_s27, %s479_s27 }
   0x6   :  { %p486_p3 = por %p485_p2, %p484_p1 }
   0x8   :  { %p487_p4 = pnand %p486_p3, %p480_p0 }
   0xa   :  { %490 = shalt.err (!%p487_p4)
}
   0xb   :  { %s541_s28 = smov [#allocation4]   ;;  %s542_s29 = smov [#allocation8]  }
   0xc   :  { %24 = dma.vmem_to_smem %s22_s26, 16, %s541_s28, [#allocation7]  }
   0xd   :  { %s30_s30 = sshll.u32 %s542_s29, 4  ;;  %s31_s30 = int_to_ptr.vmem [resolvable:$true] %s30_s30 }
   0xe   :  { %s499_s8 = scalar_lea.vmem %s31_s30, 64  ;;  %p504_p6 = scmp.lt.s32.totalorder %s31_s30, %s31_s30 }
   0xf   :  { %p500_p5 = scmp.ne.s32.totalorder %s31_s30, %s499_s8  ;;  %p505_p7 = scmp.lt.s32.totalorder %s499_s8, %s499_s8 }
  0x11   :  { %p506_p8 = por %p505_p7, %p504_p6 }
  0x13   :  { %p507_p9 = pnand %p506_p8, %p500_p5 }
  0x15   :  { %510 = shalt.err (!%p507_p9)
}
  0x16   :  { %s543_s0 = smov 32   ;;  %s544_s9 = smov 2  }
  0x17   :  { %36 = dma.hbm_to_vmem [thread:$0]  %s655_s1, 64, %s31_s30, [#allocation5], %s543_s0, %s543_s0, %s544_s9  }
  0x18   :  { %531 = dma.done.wait [#allocation7], 16  }
  0x19   :  { %532 = vsyncadd [#allocation7], 4294967280 }
  0x1a   :  { %533 = dma.done.wait [#allocation5], 64  }
  0x1b   :  { %534 = vsyncadd [#allocation5], 4294967232 }
  0x1c   :  { %51 = sfence }
  0x1d   :  { %s600_s12 = sld [smem:[#allocation4]] }
  0x23   :  { %p53_p10 = scmp.gt.s32.totalorder %s600_s12, 0  ;;  %p418_p11 = scmp.lt.s32.totalorder %s600_s12, 63 }
  0x25   :  { %s54_s13 = scalar_select %p53_p10, %s600_s12, 0 }
  0x27   :  { %s663_s13 = smov (!%p418_p11, %s54_s13), 63 }
  0x28   :  { %s57_s16 = scalar_lea.vmem %s656_s2, %s663_s13 }
  0x29   :  { %v76_v0 = vld [vmem:[%s57_s16] sm:$0x1] }
  0x2a   :  { %77 = vst [vmem:[#allocation2] sm:$0x1] %v76_v0 }
  0x2b   :  { %103 = vsyncadd [#allocation3], 16  ;;  %s608_s1 = sld [smem:[#allocation4 + $0x1]] }
  0x31   :  { %p105_p12 = scmp.gt.s32.totalorder %s608_s1, 0  ;;  %p424_p13 = scmp.lt.s32.totalorder %s608_s1, 63 }
  0x33   :  { %s106_s17 = scalar_select %p105_p12, %s608_s1, 0 }
  0x35   :  { %s665_s17 = smov (!%p424_p13, %s106_s17), 63 }
  0x36   :  { %s109_s20 = scalar_lea.vmem %s656_s2, %s665_s17 }
  0x37   :  { %v130_v1 = vld [vmem:[%s109_s20] sm:$0x1] }
  0x38   :  { %131 = vst [vmem:[#allocation2 + $0x1] sm:$0x1] %v130_v1 }
  0x39   :  { %157 = vsyncadd [#allocation3 + $0x1], 16  ;;  %v160_v2 = vld [vmem:[#allocation8 + $0x2] sm:$0x3]  ;;  %v162_v3 = vld [vmem:[%s657_s3 + $0x8] sm:$0xff]  ;;  %v545_v4 = vmov 0.0  }
  0x3a   :  { %447 = vmatprep.subr.mxu0 %v545_v4  ;;  %v161_v5 = vld [vmem:[%s657_s3] sm:$0xff]  ;;  %vm546_vm0 = vmmov 0   ;;  %vm163_vm1 = vcmask 130048  }
  0x3b   :  { %448 = vmatpush3.msra.mxu0 %v162_v3  ;;  %451 = vmatprep.mubr.msk.f32.mxu0 %vm546_vm0, %v545_v4  ;;  %v158_v6 = vld [vmem:[#allocation8] sm:$0x3] }
  0x3c   :  { %449 = vmatprep.subr.mxu0 %v545_v4 }
  0x3d   :  { %450 = vmatpush3.msra.mxu0 %v161_v5 }
  0x3e   :  { %452 = vmatmul.mubr.msk.f32.vlgmr.msra.gmra.mxu0 %vm163_vm1, %v158_v6 }
  0xfe   :  { %v233_v7 = vpop.f32.mrf.mxu0 }
 0x100   :  { %v453_v8 = vpop.f32.mrf.mxu0 }
 0x101   :  { %535 = dma.done.wait [#allocation3], 16 }
 0x102   :  { %536 = vsyncadd [#allocation3], 4294967280  ;;  %p240_p0 = scmp.lt.s32.totalorder %s600_s12, 0  ;;  %p241_p1 = scmp.ge.s32.totalorder %s600_s12, 64 }
 0x104   :  { %p242_p2 = por %p241_p1, %p240_p0 }
 0x105   :  { %vm246_vm2 = vcmask (%p242_p2), 122880   ;;  %v547_v9 = vmov (%p242_p2), 0.0  }
 0x106   :  { %245 = sbr.rel (!%p242_p2) target bundleno = 267 (0x10b), region = 97  ;;  %247 = vst.msk [vmem:[#allocation2] sm:$0x1] (%p242_p2), %vm246_vm2, %v547_v9 }
 0x10b PF:  { %537 = dma.done.wait [#allocation3 + $0x1], 16 }
 0x10c   :  { %538 = vsyncadd [#allocation3 + $0x1], 4294967280  ;;  %p250_p3 = scmp.lt.s32.totalorder %s608_s1, 0  ;;  %p251_p4 = scmp.ge.s32.totalorder %s608_s1, 64 }
 0x10e   :  { %p252_p5 = por %p251_p4, %p250_p3 }
 0x10f   :  { %vm256_vm3 = vcmask (%p252_p5), 122880   ;;  %v548_v10 = vmov (%p252_p5), 0.0  }
 0x110   :  { %255 = sbr.rel (!%p252_p5) target bundleno = 277 (0x115), region = 101  ;;  %257 = vst.msk [vmem:[#allocation2 + $0x1] sm:$0x1] (%p252_p5), %vm256_vm3, %v548_v10 }
 0x115 PF:  { %454 = vmatprep.subr.mxu1 %v545_v4  ;;  %v277_v11 = vld [vmem:[%s659_s5 + $0x18] sm:$0xff]  ;;  %v276_v12 = vld [vmem:[%s659_s5 + $0x10] sm:$0xff]  ;;  %462 = vmatprep.mubr.msk.f32.mxu1 %vm546_vm0, %v545_v4  ;;  %s549_s27 = smov 16   ;;  %v275_v13 = vld [vmem:[%s659_s5 + $0x8] sm:$0xff]  ;;  %vm285_vm4 = vcmask 261120   ;;  %vm360_vm5 = vcmask 123904  }
 0x116   :  { %270 = vrot.lane.b32.xlu0 %v160_v2, %s549_s27  ;;  %455 = vmatpush3.msra.mxu1 %v277_v11  ;;  %v274_v14 = vld [vmem:[%s659_s5] sm:$0xff]  ;;  %s550_s13 = smov [#allocation9]  }
 0x117   :  { %456 = vmatprep.subr.mxu1 %v545_v4  ;;  %v258_v15 = vld [vmem:[#allocation2] sm:$0x3] }
 0x118   :  { %457 = vmatpush3.msra.mxu1 %v276_v12  ;;  %v259_v16 = vadd.f32 %v258_v15, %v233_v7  ;;  %v430_v17 = vld [vmem:[%s658_s4] ss:$0 sm:$0xff]  ;;  %s369_s4 = sshll.u32 %s550_s13, 4  ;;  %s370_s4 = int_to_ptr.vmem [resolvable:$true] %s369_s4 }
 0x119   :  { %458 = vmatprep.subr.mxu1 %v545_v4  ;;  %v431_v22 = vld [vmem:[%s660_s6] ss:$0 sm:$0xff]  ;;  %s511_s14 = scalar_lea.vmem %s370_s4, 64  ;;  %p516_p7 = scmp.lt.s32.totalorder %s370_s4, %s370_s4 }
 0x11a   :  { %459 = vmatpush3.msra.mxu1 %v275_v13  ;;  %v267_v18 = vadd.f32 %v430_v17, %v259_v16  ;;  %p512_p6 = scmp.ne.s32.totalorder %s370_s4, %s511_s14  ;;  %p517_p8 = scmp.lt.s32.totalorder %s511_s14, %s511_s14 }
 0x11b   :  { %460 = vmatprep.subr.mxu1 %v545_v4 }
 0x11c   :  { %461 = vmatpush3.msra.mxu1 %v274_v14  ;;  %475 = vtanh.f32 %v267_v18  ;;  %p518_p9 = por %p517_p8, %p516_p7 }
 0x11e   :  { %p519_p10 = pnand %p518_p9, %p512_p6 }
 0x129   :  { %v476_v19 = vpop.eup %475 }
 0x12a   :  { %361 = vst.msk [vmem:[#allocation9] sm:$0x3] %vm360_vm5, %v476_v19 }
 0x188   :  { %v271_v20 = vpop.permute.xlu0 %270 }
 0x189   :  { %v273_v21 = vsel %vm163_vm1, %v476_v19, %v271_v20 }
 0x18a   :  { %463 = vmatmul.mubr.msk.f32.vlgmr.msra.gmra.mxu1 %vm285_vm4, %v273_v21 }
 0x24a   :  { %v355_v23 = vpop.f32.mrf.mxu1 }
 0x24b   :  { %v356_v24 = vadd.f32 %v431_v22, %v355_v23 }
 0x24c   :  { %v464_v25 = vpop.f32.mrf.mxu1 }
 0x24d   :  { %477 = vtanh.f32 %v356_v24 }
 0x25a   :  { %v478_v26 = vpop.eup %477 }
 0x25b   :  { %363 = vst.msk [vmem:[#allocation9 + $0x2] sm:$0x3] %vm360_vm5, %v478_v26 }
 0x25c   :  { %522 = shalt.err (!%p519_p10)
}
 0x25d   :  { %375 = dma.vmem_to_hbm [thread:$0]  %s370_s4, 64, %s661_s7, [#allocation6], %s543_s0, %s543_s0, %s544_s9  }
 0x25e   :  { %539 = dma.done.wait [#allocation6], 64  }
 0x25f   :  { %540 = vsyncadd [#allocation6], 4294967232 }
 0x260   :  { %379 = vsyncpa [#allocation5], 1 }
 0x261   :  { %380 = vsyncpa [#allocation6], 1 }
 0x262   :  { %381 = vsyncpa [#allocation7], 1 }
 0x263   :  { %382 = vsyncmov [#allocation3] }
 0x266   :  { %s383_s16 = vpop.sfrf %382 }
 0x267   :  { %p433_p11 = scmp.ne.s32.totalorder %s383_s16, 0 }
 0x269   :  { %387 = shalt.err (%p433_p11)  }
 0x26a   :  { %389 = vsyncmov [#allocation3 + $0x1] }
 0x26d   :  { %s390_s1 = vpop.sfrf %389 }
 0x26e   :  { %p434_p12 = scmp.ne.s32.totalorder %s390_s1, 0 }
 0x270   :  { %394 = shalt.err (%p434_p12)  }

</bundles_post_ra>
